<compile_context>
chip_gen: v5e
topology: v5e:2x2
jax: 0.10.0
libtpu: 0.0.40
codegen_flags: <defaults>
</compile_context>

<pallas_src>
import functools

import jax
import jax.numpy as jnp
from jax import lax
from jax.experimental import pallas as pl
from jax.experimental.pallas import tpu as pltpu

BN_EPS = 1e-5
LANES = 128   # every feature dim (32, 70, 96, 64, 32, 16, 1) fits in one lane tile


# ---------------------------------------------------------------------------
# In-kernel building blocks (everything works on zero-padded [rows, 128] tiles)
# ---------------------------------------------------------------------------

def _bn_full(h, gamma, beta):
    """Training-mode BatchNorm1d over the whole batch (one-pass variance)."""
    mean = jnp.mean(h, axis=0, keepdims=True)
    ex2 = jnp.mean(h * h, axis=0, keepdims=True)
    var = jnp.maximum(ex2 - mean * mean, 0.0)
    return (h - mean) * lax.rsqrt(var + BN_EPS) * gamma + beta


def _bn_two_groups(h, gamma, beta, *, half):
    """BatchNorm where rows [0:half] and [half:] are independent batches.

    Used for the fused D_Pe pass: statistics MUST be per half to match two
    separate PyTorch forward calls.  `half` is a multiple of 8, so the split
    lands on an (8, 128) tile boundary (no relayouts).
    """
    def stats(y):
        mean = jnp.mean(y, axis=0, keepdims=True)
        ex2 = jnp.mean(y * y, axis=0, keepdims=True)
        var = jnp.maximum(ex2 - mean * mean, 0.0)
        return mean, lax.rsqrt(var + BN_EPS)

    m_top, s_top = stats(h[:half])
    m_bot, s_bot = stats(h[half:])
    row = lax.broadcasted_iota(jnp.int32, h.shape, 0)
    is_top = row < half
    mean = jnp.where(is_top, m_top, m_bot)
    inv = jnp.where(is_top, s_top, s_bot)
    return (h - mean) * inv * gamma + beta


def _hidden_layers(h, w_ref, v_ref, w_base, v_base, bn_fn):
    """Three (Linear -> BN -> ReLU) blocks reading the packed slabs.

    Pre-BN linear biases are folded away (exact under batch-stat BN).
    w_ref: [7, 128, 128] bf16 weights (stored as [in, out], zero-padded)
    v_ref: [16, 128] f32; rows v_base..: gamma1, beta1, gamma2, beta2, g3, be3
    """
    for layer in range(3):
        w = w_ref[w_base + layer]                       # [128, 128] bf16
        h = jnp.dot(h.astype(jnp.bfloat16), w,
                    preferred_element_type=jnp.float32)
        r = v_base + 2 * layer
        gamma = v_ref[pl.ds(r, 1), :]                   # [1, 128]
        beta = v_ref[pl.ds(r + 1, 1), :]
        h = bn_fn(h, gamma, beta)
        h = jnp.maximum(h, 0.0)                         # ReLU
    return h


def cdan_kernel(x_ref, w_ref, v_ref, out_ref, xpad_ref, *, cdae_len, feat):
    batch = x_ref.shape[0]

    # Zero-pad x to 128 lanes in VMEM (replaces the host-side pad op).
    xpad_ref[...] = jnp.zeros_like(xpad_ref)
    xpad_ref[:, :feat] = x_ref[...]
    x = xpad_ref[...]                                   # [B, 128] f32, padded

    # --- G_A: CDAE.  Padded lanes stay exactly zero (zero-padded params). ---
    h = _hidden_layers(x, w_ref, v_ref, 0, 0, _bn_full)
    cdae = jnp.dot(h.astype(jnp.bfloat16), w_ref[3],
                   preferred_element_type=jnp.float32) + v_ref[pl.ds(6, 1), :]

    # --- Fused D_Pe over stacked [CDAE ; x]: one MXU pass per layer, BN per half.
    stacked = jnp.concatenate([cdae, x], axis=0)        # [2B, 128]
    h = _hidden_layers(stacked, w_ref, v_ref, 4, 7,
                       functools.partial(_bn_two_groups, half=batch))
    # Head Linear(16 -> 1) as VPU multiply + lane reduction (no padded matmul).
    w8 = v_ref[pl.ds(13, 1), :]                         # [1, 128], lanes>=16 zero
    b8 = v_ref[pl.ds(14, 1), pl.ds(0, 1)]               # [1, 1]
    pred = jnp.sum(h * w8, axis=-1, keepdims=True) + b8  # [2B, 1]
    ae = pred[:batch]                                   # AEPredict = D_Pe(CDAE)
    di = pred[batch:]                                   # DIPredict = D_Pe(x)

    # Single lane-dense output slab: [cdae | ae | di | zeros].
    col = lax.broadcasted_iota(jnp.int32, (batch, LANES), 1)
    out = cdae
    out = out + jnp.where(col == cdae_len, ae, 0.0)
    out = out + jnp.where(col == cdae_len + 1, di, 0.0)
    out_ref[...] = out


# ---------------------------------------------------------------------------
# Host-side packing / wrapper
# ---------------------------------------------------------------------------

def _pad_weight(w):     # [in, out] -> [128, 128]
    return jnp.pad(w, ((0, LANES - w.shape[0]), (0, LANES - w.shape[1])))


def _pad_vector(v):     # [1, F] -> [1, 128]
    return jnp.pad(v, ((0, 0), (0, LANES - v.shape[1])))


def pack_params(ga_params, dpe_params):
    """Pack the parameter arrays into two contiguous slabs.

    Each MLP's params list is [w1,b1,g1,be1, w2,b2,g2,be2, w3,b3,g3,be3, w4,b4].
    Pre-BN biases (b1,b2,b3) are dropped (exact under training-mode BN).
    """
    ga = list(ga_params)
    dp = list(dpe_params)

    # 7 weights kept as MXU tiles: G_A w1..w4, D_Pe w1..w3  -> bf16 [7,128,128]
    ws = [ga[0], ga[4], ga[8], ga[12], dp[0], dp[4], dp[8]]
    w_slab = jnp.stack([_pad_weight(w) for w in ws], axis=0).astype(jnp.bfloat16)

    # Vector slab (f32): BN params, heads' biases, D_Pe head weight row.
    ga_v = [ga[2], ga[3], ga[6], ga[7], ga[10], ga[11], ga[13]]   # rows 0..6
    dp_v = [dp[2], dp[3], dp[6], dp[7], dp[10], dp[11]]           # rows 7..12
    w8_row = dp[12].T                                             # [1, 16] row 13
    b8 = dp[13]                                                   # [1, 1]  row 14
    rows = ga_v + dp_v + [w8_row, b8]
    v_slab = jnp.concatenate([_pad_vector(v) for v in rows], axis=0)
    v_slab = jnp.pad(v_slab, ((0, 16 - v_slab.shape[0]), (0, 0)))  # [16, 128]
    return w_slab, v_slab.astype(jnp.float32)


@functools.partial(jax.jit, static_argnames=("cdae_len",))
def cdan_forward(x, w_slab, v_slab, *, cdae_len):
    batch, feat = x.shape
    assert feat <= LANES and cdae_len + 2 <= LANES
    # Keep BN per-half split on an (8,128) tile boundary (no relayouts).
    assert batch % 8 == 0, "batch must be a multiple of 8 (f32 sublane tile)"

    vmem = pl.BlockSpec(memory_space=pltpu.MemorySpace.VMEM)
    out = pl.pallas_call(
        functools.partial(cdan_kernel, cdae_len=cdae_len, feat=feat),
        out_shape=jax.ShapeDtypeStruct((batch, LANES), jnp.float32),
        in_specs=[vmem, vmem, vmem],
        out_specs=vmem,
        scratch_shapes=[pltpu.VMEM((batch, LANES), jnp.float32)],
        compiler_params=pltpu.CompilerParams(vmem_limit_bytes=32 * 1024 * 1024),
    )(x, w_slab, v_slab)

    cdae = out[:, :cdae_len]
    ae_pred = out[:, cdae_len:cdae_len + 1]
    di_pred = out[:, cdae_len + 1:cdae_len + 2]
    return cdae, ae_pred, di_pred


# ---------------------------------------------------------------------------
# Deterministic parameter init mimicking PyTorch defaults + pure-JAX reference
# ---------------------------------------------------------------------------

def make_params(key, domain_invariant_len, cdae_len):
    def linear_params(k, fan_in, fan_out):
        k1, k2 = jax.random.split(k)
        bound = 1.0 / (fan_in ** 0.5)
        w = jax.random.uniform(k1, (fan_in, fan_out), jnp.float32, -bound, bound)
        b = jax.random.uniform(k2, (1, fan_out), jnp.float32, -bound, bound)
        return w, b

    def bn_params(fan):
        return jnp.ones((1, fan), jnp.float32), jnp.zeros((1, fan), jnp.float32)

    def mlp_params(k, dims):
        keys = jax.random.split(k, 4)
        params = []
        for i in range(3):
            w, b = linear_params(keys[i], dims[i], dims[i + 1])
            g, be = bn_params(dims[i + 1])
            params += [w, b, g, be]
        w, b = linear_params(keys[3], dims[3], dims[4])
        params += [w, b]
        return params

    kga, kdpe = jax.random.split(key)
    ga = mlp_params(kga, [domain_invariant_len, 70, 96, 64, cdae_len])
    dpe = mlp_params(kdpe, [cdae_len, 64, 32, 16, 1])
    return ga, dpe


def reference_forward(x, ga, dpe):
    """Pure-JAX f32 reference matching the PyTorch module in training mode."""
    def bn(h, g, b):
        mean = jnp.mean(h, axis=0, keepdims=True)
        var = jnp.mean((h - mean) ** 2, axis=0, keepdims=True)
        return (h - mean) / jnp.sqrt(var + BN_EPS) * g + b

    def mlp(h, p):
        for i in range(3):
            w, b, g, be = p[4 * i:4 * i + 4]
            h = jnp.maximum(bn(h @ w + b, g, be), 0.0)
        return h @ p[12] + p[13]

    cdae = mlp(x, ga)
    return cdae, mlp(cdae, dpe), mlp(x, dpe)


if __name__ == "__main__":
    DOMAIN_INVARIANT_LEN = 32
    CDAE_LEN = 32          # must equal DomainInvariantLen for D_Pe(DomainInvariant)
    BATCH = 8

    key = jax.random.PRNGKey(0)
    k_param, k_x = jax.random.split(key)
    ga_params, dpe_params = make_params(k_param, DOMAIN_INVARIANT_LEN, CDAE_LEN)
    x = jax.random.normal(k_x, (BATCH, DOMAIN_INVARIANT_LEN), jnp.float32)

    # Pack once (amortized across calls); per call: 3 input DMAs, 1 output DMA.
    w_slab, v_slab = pack_params(ga_params, dpe_params)

    cdae, ae_pred, di_pred = jax.block_until_ready(
        cdan_forward(x, w_slab, v_slab, cdae_len=CDAE_LEN)
    )

    assert cdae.shape == (BATCH, CDAE_LEN)
    assert ae_pred.shape == (BATCH, 1)
    assert di_pred.shape == (BATCH, 1)

    # Loose tolerance: weights are stored/matmul'd in bf16 inside the kernel.
    cdae_r, ae_r, di_r = reference_forward(x, ga_params, dpe_params)
    assert bool(jnp.all(jnp.isfinite(cdae)))
    assert bool(jnp.allclose(cdae, cdae_r, atol=1e-1, rtol=1e-1))
    assert bool(jnp.allclose(ae_pred, ae_r, atol=1e-1, rtol=1e-1))
    assert bool(jnp.allclose(di_pred, di_r, atol=1e-1, rtol=1e-1))
    print("KERNEL_OK")
</pallas_src>

<mosaic_0001>
module attributes {stable_mosaic.version = 11 : i64} {
  func.func @cdan_kernel(%arg0: memref<8x32xf32, #tpu.memory_space<vmem>>, %arg1: memref<7x128x128xbf16, #tpu.memory_space<vmem>>, %arg2: memref<16x128xf32, #tpu.memory_space<vmem>>, %arg3: memref<8x128xf32, #tpu.memory_space<vmem>>, %arg4: memref<8x128xf32, #tpu.memory_space<vmem>>) attributes {dimension_semantics = [], scalar_prefetch = 0 : i64, scratch_operands = 1 : i64, tpu.core_type = #tpu.core_type<tc>} {
    %cst = arith.constant 0.000000e+00 : f32
    %0 = vector.broadcast %cst : f32 to vector<8x128xf32>
    %c0 = arith.constant 0 : index
    %c0_0 = arith.constant 0 : index
    %1 = vector.load %arg4[%c0, %c0_0] : memref<8x128xf32, #tpu.memory_space<vmem>>, vector<8x128xf32>
    tpu.vector_store %arg4[%c0, %c0_0], %0 {strides = array<i32>} : memref<8x128xf32, #tpu.memory_space<vmem>>, vector<8x128xf32>,
    %c0_1 = arith.constant 0 : index
    %c0_2 = arith.constant 0 : index
    %2 = vector.load %arg0[%c0_1, %c0_2] : memref<8x32xf32, #tpu.memory_space<vmem>>, vector<8x32xf32>
    %c0_3 = arith.constant 0 : index
    %c0_4 = arith.constant 0 : index
    %3 = vector.load %arg4[%c0_3, %c0_4] : memref<8x128xf32, #tpu.memory_space<vmem>>, vector<8x32xf32>
    tpu.vector_store %arg4[%c0_3, %c0_4], %2 {strides = array<i32>} : memref<8x128xf32, #tpu.memory_space<vmem>>, vector<8x32xf32>,
    %c0_5 = arith.constant 0 : index
    %c0_6 = arith.constant 0 : index
    %4 = vector.load %arg4[%c0_5, %c0_6] : memref<8x128xf32, #tpu.memory_space<vmem>>, vector<8x128xf32>
    %c0_7 = arith.constant 0 : index
    %c0_8 = arith.constant 0 : index
    %c0_9 = arith.constant 0 : index
    %5 = vector.load %arg1[%c0_7, %c0_8, %c0_9] : memref<7x128x128xbf16, #tpu.memory_space<vmem>>, vector<1x128x128xbf16>
    %6 = vector.shape_cast %5 : vector<1x128x128xbf16> to vector<128x128xbf16>
    %7 = arith.truncf %4 : vector<8x128xf32> to vector<8x128xbf16>
    %cst_10 = arith.constant dense<0.000000e+00> : vector<8x128xf32>
    %8 = tpu.matmul %7, %6, %cst_10 {dimension_numbers = #tpu.dot_dimension_numbers<[1], [0], [0], [1], [0, 0, 1, 1], [], []>} : vector<8x128xbf16>, vector<128x128xbf16>, vector<8x128xf32> -> vector<8x128xf32>
    %c0_11 = arith.constant 0 : index
    %c0_12 = arith.constant 0 : index
    %9 = vector.load %arg2[%c0_11, %c0_12] : memref<16x128xf32, #tpu.memory_space<vmem>>, vector<1x128xf32>
    %c1 = arith.constant 1 : index
    %c0_13 = arith.constant 0 : index
    %10 = vector.load %arg2[%c1, %c0_13] : memref<16x128xf32, #tpu.memory_space<vmem>>, vector<1x128xf32>
    %cst_14 = arith.constant dense<0.000000e+00> : vector<128xf32>
    %11 = vector.multi_reduction <add>, %8, %cst_14 [0] : vector<8x128xf32> to vector<128xf32>
    %12 = vector.shape_cast %11 : vector<128xf32> to vector<1x128xf32>
    %cst_15 = arith.constant 8.000000e+00 : f32
    %13 = vector.broadcast %cst_15 : f32 to vector<1x128xf32>
    %14 = arith.divf %12, %13 : vector<1x128xf32>
    %15 = arith.mulf %8, %8 : vector<8x128xf32>
    %cst_16 = arith.constant dense<0.000000e+00> : vector<128xf32>
    %16 = vector.multi_reduction <add>, %15, %cst_16 [0] : vector<8x128xf32> to vector<128xf32>
    %17 = vector.shape_cast %16 : vector<128xf32> to vector<1x128xf32>
    %cst_17 = arith.constant 8.000000e+00 : f32
    %18 = vector.broadcast %cst_17 : f32 to vector<1x128xf32>
    %19 = arith.divf %17, %18 : vector<1x128xf32>
    %20 = arith.mulf %14, %14 : vector<1x128xf32>
    %21 = arith.subf %19, %20 : vector<1x128xf32>
    %cst_18 = arith.constant 0.000000e+00 : f32
    %22 = vector.broadcast %cst_18 : f32 to vector<1x128xf32>
    %23 = arith.maximumf %21, %22 : vector<1x128xf32>
    %24 = vector.broadcast %14 : vector<1x128xf32> to vector<8x128xf32>
    %25 = arith.subf %8, %24 : vector<8x128xf32>
    %cst_19 = arith.constant 9.99999974E-6 : f32
    %26 = vector.broadcast %cst_19 : f32 to vector<1x128xf32>
    %27 = arith.addf %23, %26 : vector<1x128xf32>
    %28 = math.rsqrt %27 : vector<1x128xf32>
    %29 = vector.broadcast %28 : vector<1x128xf32> to vector<8x128xf32>
    %30 = arith.mulf %25, %29 : vector<8x128xf32>
    %31 = vector.broadcast %9 : vector<1x128xf32> to vector<8x128xf32>
    %32 = arith.mulf %30, %31 : vector<8x128xf32>
    %33 = vector.broadcast %10 : vector<1x128xf32> to vector<8x128xf32>
    %34 = arith.addf %32, %33 : vector<8x128xf32>
    %cst_20 = arith.constant 0.000000e+00 : f32
    %35 = vector.broadcast %cst_20 : f32 to vector<8x128xf32>
    %36 = arith.maximumf %34, %35 : vector<8x128xf32>
    %c1_21 = arith.constant 1 : index
    %c0_22 = arith.constant 0 : index
    %c0_23 = arith.constant 0 : index
    %37 = vector.load %arg1[%c1_21, %c0_22, %c0_23] : memref<7x128x128xbf16, #tpu.memory_space<vmem>>, vector<1x128x128xbf16>
    %38 = vector.shape_cast %37 : vector<1x128x128xbf16> to vector<128x128xbf16>
    %39 = arith.truncf %36 : vector<8x128xf32> to vector<8x128xbf16>
    %cst_24 = arith.constant dense<0.000000e+00> : vector<8x128xf32>
    %40 = tpu.matmul %39, %38, %cst_24 {dimension_numbers = #tpu.dot_dimension_numbers<[1], [0], [0], [1], [0, 0, 1, 1], [], []>} : vector<8x128xbf16>, vector<128x128xbf16>, vector<8x128xf32> -> vector<8x128xf32>
    %c2 = arith.constant 2 : index
    %c0_25 = arith.constant 0 : index
    %41 = vector.load %arg2[%c2, %c0_25] : memref<16x128xf32, #tpu.memory_space<vmem>>, vector<1x128xf32>
    %c3 = arith.constant 3 : index
    %c0_26 = arith.constant 0 : index
    %42 = vector.load %arg2[%c3, %c0_26] : memref<16x128xf32, #tpu.memory_space<vmem>>, vector<1x128xf32>
    %cst_27 = arith.constant dense<0.000000e+00> : vector<128xf32>
    %43 = vector.multi_reduction <add>, %40, %cst_27 [0] : vector<8x128xf32> to vector<128xf32>
    %44 = vector.shape_cast %43 : vector<128xf32> to vector<1x128xf32>
    %cst_28 = arith.constant 8.000000e+00 : f32
    %45 = vector.broadcast %cst_28 : f32 to vector<1x128xf32>
    %46 = arith.divf %44, %45 : vector<1x128xf32>
    %47 = arith.mulf %40, %40 : vector<8x128xf32>
    %cst_29 = arith.constant dense<0.000000e+00> : vector<128xf32>
    %48 = vector.multi_reduction <add>, %47, %cst_29 [0] : vector<8x128xf32> to vector<128xf32>
    %49 = vector.shape_cast %48 : vector<128xf32> to vector<1x128xf32>
    %cst_30 = arith.constant 8.000000e+00 : f32
    %50 = vector.broadcast %cst_30 : f32 to vector<1x128xf32>
    %51 = arith.divf %49, %50 : vector<1x128xf32>
    %52 = arith.mulf %46, %46 : vector<1x128xf32>
    %53 = arith.subf %51, %52 : vector<1x128xf32>
    %cst_31 = arith.constant 0.000000e+00 : f32
    %54 = vector.broadcast %cst_31 : f32 to vector<1x128xf32>
    %55 = arith.maximumf %53, %54 : vector<1x128xf32>
    %56 = vector.broadcast %46 : vector<1x128xf32> to vector<8x128xf32>
    %57 = arith.subf %40, %56 : vector<8x128xf32>
    %cst_32 = arith.constant 9.99999974E-6 : f32
    %58 = vector.broadcast %cst_32 : f32 to vector<1x128xf32>
    %59 = arith.addf %55, %58 : vector<1x128xf32>
    %60 = math.rsqrt %59 : vector<1x128xf32>
    %61 = vector.broadcast %60 : vector<1x128xf32> to vector<8x128xf32>
    %62 = arith.mulf %57, %61 : vector<8x128xf32>
    %63 = vector.broadcast %41 : vector<1x128xf32> to vector<8x128xf32>
    %64 = arith.mulf %62, %63 : vector<8x128xf32>
    %65 = vector.broadcast %42 : vector<1x128xf32> to vector<8x128xf32>
    %66 = arith.addf %64, %65 : vector<8x128xf32>
    %cst_33 = arith.constant 0.000000e+00 : f32
    %67 = vector.broadcast %cst_33 : f32 to vector<8x128xf32>
    %68 = arith.maximumf %66, %67 : vector<8x128xf32>
    %c2_34 = arith.constant 2 : index
    %c0_35 = arith.constant 0 : index
    %c0_36 = arith.constant 0 : index
    %69 = vector.load %arg1[%c2_34, %c0_35, %c0_36] : memref<7x128x128xbf16, #tpu.memory_space<vmem>>, vector<1x128x128xbf16>
    %70 = vector.shape_cast %69 : vector<1x128x128xbf16> to vector<128x128xbf16>
    %71 = arith.truncf %68 : vector<8x128xf32> to vector<8x128xbf16>
    %cst_37 = arith.constant dense<0.000000e+00> : vector<8x128xf32>
    %72 = tpu.matmul %71, %70, %cst_37 {dimension_numbers = #tpu.dot_dimension_numbers<[1], [0], [0], [1], [0, 0, 1, 1], [], []>} : vector<8x128xbf16>, vector<128x128xbf16>, vector<8x128xf32> -> vector<8x128xf32>
    %c4 = arith.constant 4 : index
    %c0_38 = arith.constant 0 : index
    %73 = vector.load %arg2[%c4, %c0_38] : memref<16x128xf32, #tpu.memory_space<vmem>>, vector<1x128xf32>
    %c5 = arith.constant 5 : index
    %c0_39 = arith.constant 0 : index
    %74 = vector.load %arg2[%c5, %c0_39] : memref<16x128xf32, #tpu.memory_space<vmem>>, vector<1x128xf32>
    %cst_40 = arith.constant dense<0.000000e+00> : vector<128xf32>
    %75 = vector.multi_reduction <add>, %72, %cst_40 [0] : vector<8x128xf32> to vector<128xf32>
    %76 = vector.shape_cast %75 : vector<128xf32> to vector<1x128xf32>
    %cst_41 = arith.constant 8.000000e+00 : f32
    %77 = vector.broadcast %cst_41 : f32 to vector<1x128xf32>
    %78 = arith.divf %76, %77 : vector<1x128xf32>
    %79 = arith.mulf %72, %72 : vector<8x128xf32>
    %cst_42 = arith.constant dense<0.000000e+00> : vector<128xf32>
    %80 = vector.multi_reduction <add>, %79, %cst_42 [0] : vector<8x128xf32> to vector<128xf32>
    %81 = vector.shape_cast %80 : vector<128xf32> to vector<1x128xf32>
    %cst_43 = arith.constant 8.000000e+00 : f32
    %82 = vector.broadcast %cst_43 : f32 to vector<1x128xf32>
    %83 = arith.divf %81, %82 : vector<1x128xf32>
    %84 = arith.mulf %78, %78 : vector<1x128xf32>
    %85 = arith.subf %83, %84 : vector<1x128xf32>
    %cst_44 = arith.constant 0.000000e+00 : f32
    %86 = vector.broadcast %cst_44 : f32 to vector<1x128xf32>
    %87 = arith.maximumf %85, %86 : vector<1x128xf32>
    %88 = vector.broadcast %78 : vector<1x128xf32> to vector<8x128xf32>
    %89 = arith.subf %72, %88 : vector<8x128xf32>
    %cst_45 = arith.constant 9.99999974E-6 : f32
    %90 = vector.broadcast %cst_45 : f32 to vector<1x128xf32>
    %91 = arith.addf %87, %90 : vector<1x128xf32>
    %92 = math.rsqrt %91 : vector<1x128xf32>
    %93 = vector.broadcast %92 : vector<1x128xf32> to vector<8x128xf32>
    %94 = arith.mulf %89, %93 : vector<8x128xf32>
    %95 = vector.broadcast %73 : vector<1x128xf32> to vector<8x128xf32>
    %96 = arith.mulf %94, %95 : vector<8x128xf32>
    %97 = vector.broadcast %74 : vector<1x128xf32> to vector<8x128xf32>
    %98 = arith.addf %96, %97 : vector<8x128xf32>
    %cst_46 = arith.constant 0.000000e+00 : f32
    %99 = vector.broadcast %cst_46 : f32 to vector<8x128xf32>
    %100 = arith.maximumf %98, %99 : vector<8x128xf32>
    %101 = arith.truncf %100 : vector<8x128xf32> to vector<8x128xbf16>
    %c3_47 = arith.constant 3 : index
    %c0_48 = arith.constant 0 : index
    %c0_49 = arith.constant 0 : index
    %102 = vector.load %arg1[%c3_47, %c0_48, %c0_49] : memref<7x128x128xbf16, #tpu.memory_space<vmem>>, vector<1x128x128xbf16>
    %103 = vector.shape_cast %102 : vector<1x128x128xbf16> to vector<128x128xbf16>
    %cst_50 = arith.constant dense<0.000000e+00> : vector<8x128xf32>
    %104 = tpu.matmul %101, %103, %cst_50 {dimension_numbers = #tpu.dot_dimension_numbers<[1], [0], [0], [1], [0, 0, 1, 1], [], []>} : vector<8x128xbf16>, vector<128x128xbf16>, vector<8x128xf32> -> vector<8x128xf32>
    %c6 = arith.constant 6 : index
    %c0_51 = arith.constant 0 : index
    %105 = vector.load %arg2[%c6, %c0_51] : memref<16x128xf32, #tpu.memory_space<vmem>>, vector<1x128xf32>
    %106 = vector.broadcast %105 : vector<1x128xf32> to vector<8x128xf32>
    %107 = arith.addf %104, %106 : vector<8x128xf32>
    %108 = tpu.concatenate %107, %4 in 0 : vector<8x128xf32>, vector<8x128xf32> -> vector<16x128xf32>
    %c4_52 = arith.constant 4 : index
    %c0_53 = arith.constant 0 : index
    %c0_54 = arith.constant 0 : index
    %109 = vector.load %arg1[%c4_52, %c0_53, %c0_54] : memref<7x128x128xbf16, #tpu.memory_space<vmem>>, vector<1x128x128xbf16>
    %110 = vector.shape_cast %109 : vector<1x128x128xbf16> to vector<128x128xbf16>
    %111 = arith.truncf %108 : vector<16x128xf32> to vector<16x128xbf16>
    %cst_55 = arith.constant dense<0.000000e+00> : vector<16x128xf32>
    %112 = tpu.matmul %111, %110, %cst_55 {dimension_numbers = #tpu.dot_dimension_numbers<[1], [0], [0], [1], [0, 0, 1, 1], [], []>} : vector<16x128xbf16>, vector<128x128xbf16>, vector<16x128xf32> -> vector<16x128xf32>
    %c7 = arith.constant 7 : index
    %c0_56 = arith.constant 0 : index
    %113 = vector.load %arg2[%c7, %c0_56] : memref<16x128xf32, #tpu.memory_space<vmem>>, vector<1x128xf32>
    %c8 = arith.constant 8 : index
    %c0_57 = arith.constant 0 : index
    %114 = vector.load %arg2[%c8, %c0_57] : memref<16x128xf32, #tpu.memory_space<vmem>>, vector<1x128xf32>
    %115 = vector.extract_strided_slice %112 {offsets = [0, 0], sizes = [8, 128], strides = [1, 1]} : vector<16x128xf32> to vector<8x128xf32>
    %cst_58 = arith.constant dense<0.000000e+00> : vector<128xf32>
    %116 = vector.multi_reduction <add>, %115, %cst_58 [0] : vector<8x128xf32> to vector<128xf32>
    %117 = vector.shape_cast %116 : vector<128xf32> to vector<1x128xf32>
    %cst_59 = arith.constant 8.000000e+00 : f32
    %118 = vector.broadcast %cst_59 : f32 to vector<1x128xf32>
    %119 = arith.divf %117, %118 : vector<1x128xf32>
    %120 = arith.mulf %115, %115 : vector<8x128xf32>
    %cst_60 = arith.constant dense<0.000000e+00> : vector<128xf32>
    %121 = vector.multi_reduction <add>, %120, %cst_60 [0] : vector<8x128xf32> to vector<128xf32>
    %122 = vector.shape_cast %121 : vector<128xf32> to vector<1x128xf32>
    %cst_61 = arith.constant 8.000000e+00 : f32
    %123 = vector.broadcast %cst_61 : f32 to vector<1x128xf32>
    %124 = arith.divf %122, %123 : vector<1x128xf32>
    %125 = arith.mulf %119, %119 : vector<1x128xf32>
    %126 = arith.subf %124, %125 : vector<1x128xf32>
    %cst_62 = arith.constant 0.000000e+00 : f32
    %127 = vector.broadcast %cst_62 : f32 to vector<1x128xf32>
    %128 = arith.maximumf %126, %127 : vector<1x128xf32>
    %cst_63 = arith.constant 9.99999974E-6 : f32
    %129 = vector.broadcast %cst_63 : f32 to vector<1x128xf32>
    %130 = arith.addf %128, %129 : vector<1x128xf32>
    %131 = math.rsqrt %130 : vector<1x128xf32>
    %132 = vector.extract_strided_slice %112 {offsets = [8, 0], sizes = [8, 128], strides = [1, 1]} : vector<16x128xf32> to vector<8x128xf32>
    %cst_64 = arith.constant dense<0.000000e+00> : vector<128xf32>
    %133 = vector.multi_reduction <add>, %132, %cst_64 [0] : vector<8x128xf32> to vector<128xf32>
    %134 = vector.shape_cast %133 : vector<128xf32> to vector<1x128xf32>
    %cst_65 = arith.constant 8.000000e+00 : f32
    %135 = vector.broadcast %cst_65 : f32 to vector<1x128xf32>
    %136 = arith.divf %134, %135 : vector<1x128xf32>
    %137 = arith.mulf %132, %132 : vector<8x128xf32>
    %cst_66 = arith.constant dense<0.000000e+00> : vector<128xf32>
    %138 = vector.multi_reduction <add>, %137, %cst_66 [0] : vector<8x128xf32> to vector<128xf32>
    %139 = vector.shape_cast %138 : vector<128xf32> to vector<1x128xf32>
    %cst_67 = arith.constant 8.000000e+00 : f32
    %140 = vector.broadcast %cst_67 : f32 to vector<1x128xf32>
    %141 = arith.divf %139, %140 : vector<1x128xf32>
    %142 = arith.mulf %136, %136 : vector<1x128xf32>
    %143 = arith.subf %141, %142 : vector<1x128xf32>
    %cst_68 = arith.constant 0.000000e+00 : f32
    %144 = vector.broadcast %cst_68 : f32 to vector<1x128xf32>
    %145 = arith.maximumf %143, %144 : vector<1x128xf32>
    %cst_69 = arith.constant 9.99999974E-6 : f32
    %146 = vector.broadcast %cst_69 : f32 to vector<1x128xf32>
    %147 = arith.addf %145, %146 : vector<1x128xf32>
    %148 = math.rsqrt %147 : vector<1x128xf32>
    %149 = tpu.iota {dimensions = array<i32: 0>} : vector<16x128xi32>
    %c8_i32 = arith.constant 8 : i32
    %150 = vector.broadcast %c8_i32 : i32 to vector<16x128xi32>
    %151 = arith.cmpi slt, %149, %150 : vector<16x128xi32>
    %152 = vector.shape_cast %119 : vector<1x128xf32> to vector<1x128xf32>
    %153 = vector.broadcast %152 : vector<1x128xf32> to vector<16x128xf32>
    %154 = vector.shape_cast %136 : vector<1x128xf32> to vector<1x128xf32>
    %155 = vector.broadcast %154 : vector<1x128xf32> to vector<16x128xf32>
    %156 = arith.select %151, %153, %155 : vector<16x128xi1>, vector<16x128xf32>
    %157 = vector.shape_cast %131 : vector<1x128xf32> to vector<1x128xf32>
    %158 = vector.broadcast %157 : vector<1x128xf32> to vector<16x128xf32>
    %159 = vector.shape_cast %148 : vector<1x128xf32> to vector<1x128xf32>
    %160 = vector.broadcast %159 : vector<1x128xf32> to vector<16x128xf32>
    %161 = arith.select %151, %158, %160 : vector<16x128xi1>, vector<16x128xf32>
    %162 = arith.subf %112, %156 : vector<16x128xf32>
    %163 = arith.mulf %162, %161 : vector<16x128xf32>
    %164 = vector.broadcast %113 : vector<1x128xf32> to vector<16x128xf32>
    %165 = arith.mulf %163, %164 : vector<16x128xf32>
    %166 = vector.broadcast %114 : vector<1x128xf32> to vector<16x128xf32>
    %167 = arith.addf %165, %166 : vector<16x128xf32>
    %cst_70 = arith.constant 0.000000e+00 : f32
    %168 = vector.broadcast %cst_70 : f32 to vector<16x128xf32>
    %169 = arith.maximumf %167, %168 : vector<16x128xf32>
    %c5_71 = arith.constant 5 : index
    %c0_72 = arith.constant 0 : index
    %c0_73 = arith.constant 0 : index
    %170 = vector.load %arg1[%c5_71, %c0_72, %c0_73] : memref<7x128x128xbf16, #tpu.memory_space<vmem>>, vector<1x128x128xbf16>
    %171 = vector.shape_cast %170 : vector<1x128x128xbf16> to vector<128x128xbf16>
    %172 = arith.truncf %169 : vector<16x128xf32> to vector<16x128xbf16>
    %cst_74 = arith.constant dense<0.000000e+00> : vector<16x128xf32>
    %173 = tpu.matmul %172, %171, %cst_74 {dimension_numbers = #tpu.dot_dimension_numbers<[1], [0], [0], [1], [0, 0, 1, 1], [], []>} : vector<16x128xbf16>, vector<128x128xbf16>, vector<16x128xf32> -> vector<16x128xf32>
    %c9 = arith.constant 9 : index
    %c0_75 = arith.constant 0 : index
    %174 = vector.load %arg2[%c9, %c0_75] : memref<16x128xf32, #tpu.memory_space<vmem>>, vector<1x128xf32>
    %c10 = arith.constant 10 : index
    %c0_76 = arith.constant 0 : index
    %175 = vector.load %arg2[%c10, %c0_76] : memref<16x128xf32, #tpu.memory_space<vmem>>, vector<1x128xf32>
    %176 = vector.extract_strided_slice %173 {offsets = [0, 0], sizes = [8, 128], strides = [1, 1]} : vector<16x128xf32> to vector<8x128xf32>
    %cst_77 = arith.constant dense<0.000000e+00> : vector<128xf32>
    %177 = vector.multi_reduction <add>, %176, %cst_77 [0] : vector<8x128xf32> to vector<128xf32>
    %178 = vector.shape_cast %177 : vector<128xf32> to vector<1x128xf32>
    %cst_78 = arith.constant 8.000000e+00 : f32
    %179 = vector.broadcast %cst_78 : f32 to vector<1x128xf32>
    %180 = arith.divf %178, %179 : vector<1x128xf32>
    %181 = arith.mulf %176, %176 : vector<8x128xf32>
    %cst_79 = arith.constant dense<0.000000e+00> : vector<128xf32>
    %182 = vector.multi_reduction <add>, %181, %cst_79 [0] : vector<8x128xf32> to vector<128xf32>
    %183 = vector.shape_cast %182 : vector<128xf32> to vector<1x128xf32>
    %cst_80 = arith.constant 8.000000e+00 : f32
    %184 = vector.broadcast %cst_80 : f32 to vector<1x128xf32>
    %185 = arith.divf %183, %184 : vector<1x128xf32>
    %186 = arith.mulf %180, %180 : vector<1x128xf32>
    %187 = arith.subf %185, %186 : vector<1x128xf32>
    %cst_81 = arith.constant 0.000000e+00 : f32
    %188 = vector.broadcast %cst_81 : f32 to vector<1x128xf32>
    %189 = arith.maximumf %187, %188 : vector<1x128xf32>
    %cst_82 = arith.constant 9.99999974E-6 : f32
    %190 = vector.broadcast %cst_82 : f32 to vector<1x128xf32>
    %191 = arith.addf %189, %190 : vector<1x128xf32>
    %192 = math.rsqrt %191 : vector<1x128xf32>
    %193 = vector.extract_strided_slice %173 {offsets = [8, 0], sizes = [8, 128], strides = [1, 1]} : vector<16x128xf32> to vector<8x128xf32>
    %cst_83 = arith.constant dense<0.000000e+00> : vector<128xf32>
    %194 = vector.multi_reduction <add>, %193, %cst_83 [0] : vector<8x128xf32> to vector<128xf32>
    %195 = vector.shape_cast %194 : vector<128xf32> to vector<1x128xf32>
    %cst_84 = arith.constant 8.000000e+00 : f32
    %196 = vector.broadcast %cst_84 : f32 to vector<1x128xf32>
    %197 = arith.divf %195, %196 : vector<1x128xf32>
    %198 = arith.mulf %193, %193 : vector<8x128xf32>
    %cst_85 = arith.constant dense<0.000000e+00> : vector<128xf32>
    %199 = vector.multi_reduction <add>, %198, %cst_85 [0] : vector<8x128xf32> to vector<128xf32>
    %200 = vector.shape_cast %199 : vector<128xf32> to vector<1x128xf32>
    %cst_86 = arith.constant 8.000000e+00 : f32
    %201 = vector.broadcast %cst_86 : f32 to vector<1x128xf32>
    %202 = arith.divf %200, %201 : vector<1x128xf32>
    %203 = arith.mulf %197, %197 : vector<1x128xf32>
    %204 = arith.subf %202, %203 : vector<1x128xf32>
    %cst_87 = arith.constant 0.000000e+00 : f32
    %205 = vector.broadcast %cst_87 : f32 to vector<1x128xf32>
    %206 = arith.maximumf %204, %205 : vector<1x128xf32>
    %cst_88 = arith.constant 9.99999974E-6 : f32
    %207 = vector.broadcast %cst_88 : f32 to vector<1x128xf32>
    %208 = arith.addf %206, %207 : vector<1x128xf32>
    %209 = math.rsqrt %208 : vector<1x128xf32>
    %210 = tpu.iota {dimensions = array<i32: 0>} : vector<16x128xi32>
    %c8_i32_89 = arith.constant 8 : i32
    %211 = vector.broadcast %c8_i32_89 : i32 to vector<16x128xi32>
    %212 = arith.cmpi slt, %210, %211 : vector<16x128xi32>
    %213 = vector.shape_cast %180 : vector<1x128xf32> to vector<1x128xf32>
    %214 = vector.broadcast %213 : vector<1x128xf32> to vector<16x128xf32>
    %215 = vector.shape_cast %197 : vector<1x128xf32> to vector<1x128xf32>
    %216 = vector.broadcast %215 : vector<1x128xf32> to vector<16x128xf32>
    %217 = arith.select %212, %214, %216 : vector<16x128xi1>, vector<16x128xf32>
    %218 = vector.shape_cast %192 : vector<1x128xf32> to vector<1x128xf32>
    %219 = vector.broadcast %218 : vector<1x128xf32> to vector<16x128xf32>
    %220 = vector.shape_cast %209 : vector<1x128xf32> to vector<1x128xf32>
    %221 = vector.broadcast %220 : vector<1x128xf32> to vector<16x128xf32>
    %222 = arith.select %212, %219, %221 : vector<16x128xi1>, vector<16x128xf32>
    %223 = arith.subf %173, %217 : vector<16x128xf32>
    %224 = arith.mulf %223, %222 : vector<16x128xf32>
    %225 = vector.broadcast %174 : vector<1x128xf32> to vector<16x128xf32>
    %226 = arith.mulf %224, %225 : vector<16x128xf32>
    %227 = vector.broadcast %175 : vector<1x128xf32> to vector<16x128xf32>
    %228 = arith.addf %226, %227 : vector<16x128xf32>
    %cst_90 = arith.constant 0.000000e+00 : f32
    %229 = vector.broadcast %cst_90 : f32 to vector<16x128xf32>
    %230 = arith.maximumf %228, %229 : vector<16x128xf32>
    %c6_91 = arith.constant 6 : index
    %c0_92 = arith.constant 0 : index
    %c0_93 = arith.constant 0 : index
    %231 = vector.load %arg1[%c6_91, %c0_92, %c0_93] : memref<7x128x128xbf16, #tpu.memory_space<vmem>>, vector<1x128x128xbf16>
    %232 = vector.shape_cast %231 : vector<1x128x128xbf16> to vector<128x128xbf16>
    %233 = arith.truncf %230 : vector<16x128xf32> to vector<16x128xbf16>
    %cst_94 = arith.constant dense<0.000000e+00> : vector<16x128xf32>
    %234 = tpu.matmul %233, %232, %cst_94 {dimension_numbers = #tpu.dot_dimension_numbers<[1], [0], [0], [1], [0, 0, 1, 1], [], []>} : vector<16x128xbf16>, vector<128x128xbf16>, vector<16x128xf32> -> vector<16x128xf32>
    %c11 = arith.constant 11 : index
    %c0_95 = arith.constant 0 : index
    %235 = vector.load %arg2[%c11, %c0_95] : memref<16x128xf32, #tpu.memory_space<vmem>>, vector<1x128xf32>
    %c12 = arith.constant 12 : index
    %c0_96 = arith.constant 0 : index
    %236 = vector.load %arg2[%c12, %c0_96] : memref<16x128xf32, #tpu.memory_space<vmem>>, vector<1x128xf32>
    %237 = vector.extract_strided_slice %234 {offsets = [0, 0], sizes = [8, 128], strides = [1, 1]} : vector<16x128xf32> to vector<8x128xf32>
    %cst_97 = arith.constant dense<0.000000e+00> : vector<128xf32>
    %238 = vector.multi_reduction <add>, %237, %cst_97 [0] : vector<8x128xf32> to vector<128xf32>
    %239 = vector.shape_cast %238 : vector<128xf32> to vector<1x128xf32>
    %cst_98 = arith.constant 8.000000e+00 : f32
    %240 = vector.broadcast %cst_98 : f32 to vector<1x128xf32>
    %241 = arith.divf %239, %240 : vector<1x128xf32>
    %242 = arith.mulf %237, %237 : vector<8x128xf32>
    %cst_99 = arith.constant dense<0.000000e+00> : vector<128xf32>
    %243 = vector.multi_reduction <add>, %242, %cst_99 [0] : vector<8x128xf32> to vector<128xf32>
    %244 = vector.shape_cast %243 : vector<128xf32> to vector<1x128xf32>
    %cst_100 = arith.constant 8.000000e+00 : f32
    %245 = vector.broadcast %cst_100 : f32 to vector<1x128xf32>
    %246 = arith.divf %244, %245 : vector<1x128xf32>
    %247 = arith.mulf %241, %241 : vector<1x128xf32>
    %248 = arith.subf %246, %247 : vector<1x128xf32>
    %cst_101 = arith.constant 0.000000e+00 : f32
    %249 = vector.broadcast %cst_101 : f32 to vector<1x128xf32>
    %250 = arith.maximumf %248, %249 : vector<1x128xf32>
    %cst_102 = arith.constant 9.99999974E-6 : f32
    %251 = vector.broadcast %cst_102 : f32 to vector<1x128xf32>
    %252 = arith.addf %250, %251 : vector<1x128xf32>
    %253 = math.rsqrt %252 : vector<1x128xf32>
    %254 = vector.extract_strided_slice %234 {offsets = [8, 0], sizes = [8, 128], strides = [1, 1]} : vector<16x128xf32> to vector<8x128xf32>
    %cst_103 = arith.constant dense<0.000000e+00> : vector<128xf32>
    %255 = vector.multi_reduction <add>, %254, %cst_103 [0] : vector<8x128xf32> to vector<128xf32>
    %256 = vector.shape_cast %255 : vector<128xf32> to vector<1x128xf32>
    %cst_104 = arith.constant 8.000000e+00 : f32
    %257 = vector.broadcast %cst_104 : f32 to vector<1x128xf32>
    %258 = arith.divf %256, %257 : vector<1x128xf32>
    %259 = arith.mulf %254, %254 : vector<8x128xf32>
    %cst_105 = arith.constant dense<0.000000e+00> : vector<128xf32>
    %260 = vector.multi_reduction <add>, %259, %cst_105 [0] : vector<8x128xf32> to vector<128xf32>
    %261 = vector.shape_cast %260 : vector<128xf32> to vector<1x128xf32>
    %cst_106 = arith.constant 8.000000e+00 : f32
    %262 = vector.broadcast %cst_106 : f32 to vector<1x128xf32>
    %263 = arith.divf %261, %262 : vector<1x128xf32>
    %264 = arith.mulf %258, %258 : vector<1x128xf32>
    %265 = arith.subf %263, %264 : vector<1x128xf32>
    %cst_107 = arith.constant 0.000000e+00 : f32
    %266 = vector.broadcast %cst_107 : f32 to vector<1x128xf32>
    %267 = arith.maximumf %265, %266 : vector<1x128xf32>
    %cst_108 = arith.constant 9.99999974E-6 : f32
    %268 = vector.broadcast %cst_108 : f32 to vector<1x128xf32>
    %269 = arith.addf %267, %268 : vector<1x128xf32>
    %270 = math.rsqrt %269 : vector<1x128xf32>
    %271 = tpu.iota {dimensions = array<i32: 0>} : vector<16x128xi32>
    %c8_i32_109 = arith.constant 8 : i32
    %272 = vector.broadcast %c8_i32_109 : i32 to vector<16x128xi32>
    %273 = arith.cmpi slt, %271, %272 : vector<16x128xi32>
    %274 = vector.shape_cast %241 : vector<1x128xf32> to vector<1x128xf32>
    %275 = vector.broadcast %274 : vector<1x128xf32> to vector<16x128xf32>
    %276 = vector.shape_cast %258 : vector<1x128xf32> to vector<1x128xf32>
    %277 = vector.broadcast %276 : vector<1x128xf32> to vector<16x128xf32>
    %278 = arith.select %273, %275, %277 : vector<16x128xi1>, vector<16x128xf32>
    %279 = vector.shape_cast %253 : vector<1x128xf32> to vector<1x128xf32>
    %280 = vector.broadcast %279 : vector<1x128xf32> to vector<16x128xf32>
    %281 = vector.shape_cast %270 : vector<1x128xf32> to vector<1x128xf32>
    %282 = vector.broadcast %281 : vector<1x128xf32> to vector<16x128xf32>
    %283 = arith.select %273, %280, %282 : vector<16x128xi1>, vector<16x128xf32>
    %284 = arith.subf %234, %278 : vector<16x128xf32>
    %285 = arith.mulf %284, %283 : vector<16x128xf32>
    %286 = vector.broadcast %235 : vector<1x128xf32> to vector<16x128xf32>
    %287 = arith.mulf %285, %286 : vector<16x128xf32>
    %288 = vector.broadcast %236 : vector<1x128xf32> to vector<16x128xf32>
    %289 = arith.addf %287, %288 : vector<16x128xf32>
    %cst_110 = arith.constant 0.000000e+00 : f32
    %290 = vector.broadcast %cst_110 : f32 to vector<16x128xf32>
    %291 = arith.maximumf %289, %290 : vector<16x128xf32>
    %c13 = arith.constant 13 : index
    %c0_111 = arith.constant 0 : index
    %292 = vector.load %arg2[%c13, %c0_111] : memref<16x128xf32, #tpu.memory_space<vmem>>, vector<1x128xf32>
    %c14 = arith.constant 14 : index
    %c0_112 = arith.constant 0 : index
    %293 = vector.load %arg2[%c14, %c0_112] : memref<16x128xf32, #tpu.memory_space<vmem>>, vector<1x1xf32>
    %294 = vector.broadcast %292 : vector<1x128xf32> to vector<16x128xf32>
    %295 = arith.mulf %291, %294 : vector<16x128xf32>
    %cst_113 = arith.constant dense<0.000000e+00> : vector<16xf32>
    %296 = vector.multi_reduction <add>, %295, %cst_113 [1] : vector<16x128xf32> to vector<16xf32>
    %297 = vector.shape_cast %296 : vector<16xf32> to vector<16x1xf32>
    %298 = vector.broadcast %293 : vector<1x1xf32> to vector<16x1xf32>
    %299 = arith.addf %297, %298 : vector<16x1xf32>
    %300 = vector.extract_strided_slice %299 {offsets = [0, 0], sizes = [8, 1], strides = [1, 1]} : vector<16x1xf32> to vector<8x1xf32>
    %301 = vector.extract_strided_slice %299 {offsets = [8, 0], sizes = [8, 1], strides = [1, 1]} : vector<16x1xf32> to vector<8x1xf32>
    %302 = tpu.iota {dimensions = array<i32: 1>} : vector<8x128xi32>
    %c32_i32 = arith.constant 32 : i32
    %303 = vector.broadcast %c32_i32 : i32 to vector<8x128xi32>
    %304 = arith.cmpi eq, %302, %303 : vector<8x128xi32>
    %cst_114 = arith.constant 0.000000e+00 : f32
    %305 = vector.shape_cast %300 : vector<8x1xf32> to vector<8x1xf32>
    %306 = vector.broadcast %305 : vector<8x1xf32> to vector<8x128xf32>
    %307 = vector.broadcast %cst_114 : f32 to vector<8x128xf32>
    %308 = arith.select %304, %306, %307 : vector<8x128xi1>, vector<8x128xf32>
    %309 = arith.addf %107, %308 : vector<8x128xf32>
    %c33_i32 = arith.constant 33 : i32
    %310 = vector.broadcast %c33_i32 : i32 to vector<8x128xi32>
    %311 = arith.cmpi eq, %302, %310 : vector<8x128xi32>
    %cst_115 = arith.constant 0.000000e+00 : f32
    %312 = vector.shape_cast %301 : vector<8x1xf32> to vector<8x1xf32>
    %313 = vector.broadcast %312 : vector<8x1xf32> to vector<8x128xf32>
    %314 = vector.broadcast %cst_115 : f32 to vector<8x128xf32>
    %315 = arith.select %311, %313, %314 : vector<8x128xi1>, vector<8x128xf32>
    %316 = arith.addf %309, %315 : vector<8x128xf32>
    %c0_116 = arith.constant 0 : index
    %c0_117 = arith.constant 0 : index
    %317 = vector.load %arg3[%c0_116, %c0_117] : memref<8x128xf32, #tpu.memory_space<vmem>>, vector<8x128xf32>
    tpu.vector_store %arg3[%c0_116, %c0_117], %316 {strides = array<i32>} : memref<8x128xf32, #tpu.memory_space<vmem>>, vector<8x128xf32>,
    return
  }
}

</mosaic_0001>

<bundles_post_ra>
// kernel: cdan_forward.1
= control target key start
LH: loop header
LB: loop body
LE: loop exit
PB: predicated region body
PF: predicated region fallthrough
CT: control target
= control target key end

     0   :  { %8 = vsyncpa [#allocation4], 0  ;;  %s1521_s0 = inlined_call_operand.hbm [shape: f32[8,32], index: 0, kind: input, shape index: {}]   ;;  %s1522_s1 = inlined_call_operand.hbm [shape: bf16[7,128,128], index: 1, kind: input, shape index: {}]   ;;  %s1523_s2 = inlined_call_operand.hbm [shape: f32[16,128], index: 2, kind: input, shape index: {}]   ;;  %s1524_s3 = inlined_call_operand.vmem [shape: f32[8,128], index: 3, kind: output, shape index: {}]  }
   0x1   :  { %9 = vsyncpa [#allocation6], 0  ;;  %s25_s14 = sshll.u32 %s1522_s1, 4  ;;  %s1415_s15 = smov [#allocation5]   ;;  %s26_s14 = int_to_ptr.hbm [resolvable:$true] %s25_s14 }
   0x2   :  { %s27_s16 = sshll.u32 %s1415_s15, 4  ;;  %s15_s19 = sshll.u32 %s1521_s0, 4  ;;  %s28_s16 = int_to_ptr.vmem [resolvable:$true] %s27_s16  ;;  %s16_s19 = int_to_ptr.hbm [resolvable:$true] %s15_s19 }
   0x3   :  { %s1416_s20 = smov 64   ;;  %s1417_s21 = smov 4  }
   0x4   :  { %33 = dma.hbm_to_vmem [thread:$0]  %s26_s14, 7168, %s28_s16, [#allocation6], %s1416_s20, %s1416_s20, %s1417_s21  }
   0x5   :  { %s1418_s22 = smov [#allocation3]   ;;  %s38_s26 = sshll.u32 %s1523_s2, 4  ;;  %s39_s26 = int_to_ptr.hbm [resolvable:$true] %s38_s26 }
   0x6   :  { %s17_s23 = sshll.u32 %s1418_s22, 4  ;;  %s1419_s1 = smov [#allocation7]   ;;  %s18_s23 = int_to_ptr.vmem [resolvable:$true] %s17_s23 }
   0x7   :  { %20 = dma.hbm_to_vmem [thread:$0]  %s16_s19, 128, %s18_s23, [#allocation4]  }
   0x8   :  { %s40_s27 = sshll.u32 %s1419_s1, 4  ;;  %s1420_s28 = smov 128   ;;  %s41_s27 = int_to_ptr.vmem [resolvable:$true] %s40_s27 }
   0x9   :  { %s1421_s29 = smov 8  }
   0xa   :  { %46 = dma.hbm_to_vmem [thread:$0]  %s39_s26, 256, %s41_s27, [#allocation6], %s1420_s28, %s1420_s28, %s1421_s29  }
   0xb   :  { %1411 = dma.done.wait [#allocation4], 128  }
   0xc   :  { %1412 = vsyncadd [#allocation4], 4294967168 }
   0xd   :  { %1413 = dma.done.wait [#allocation6], 7424  }
   0xe   :  { %1414 = vsyncadd [#allocation6], 4294959872  ;;  %v1422_v0 = vmov 0.0   ;;  %v1243_v1 = vld [vmem:[#allocation5 + $0x38] sm:$0xff]  ;;  %vm61_vm0 = vcmask 261120   ;;  %v1242_v2 = vld [vmem:[#allocation5 + $0x30] sm:$0xff] }
   0xf   :  { %59 = vst [vmem:[#allocation2] sm:$0xff] %v1422_v0  ;;  %129 = vmatpush.bf16.msra.mxu0 %v1243_v1  ;;  %v60_v3 = vld [vmem:[#allocation3] sm:$0xff]  ;;  %v1241_v4 = vld [vmem:[#allocation5 + $0x28] sm:$0xff]  ;;  %v1240_v5 = vld [vmem:[#allocation5 + $0x20] sm:$0xff]  ;;  %v1423_v12 = vmov 8.0  }
  0x10   :  { %62 = vst.msk [vmem:[#allocation2] sm:$0xff] %vm61_vm0, %v60_v3  ;;  %v1239_v6 = vld [vmem:[#allocation5 + $0x18] sm:$0xff]  ;;  %v1238_v7 = vld [vmem:[#allocation5 + $0x10] sm:$0xff]  ;;  %v1237_v8 = vld [vmem:[#allocation5 + $0x8] sm:$0xff]  ;;  %1319 = vrcp.f32 %v1423_v12 }
  0x11   :  { %v1236_v9 = vld [vmem:[#allocation5] sm:$0xff]  ;;  %v1251_v13 = vld [vmem:[#allocation5 + $0x78] sm:$0xff]  ;;  %v1250_v14 = vld [vmem:[#allocation5 + $0x70] sm:$0xff] }
  0x12   :  { %253 = vmatpush.bf16.msra.mxu1 %v1251_v13  ;;  %v1249_v16 = vld [vmem:[#allocation5 + $0x68] sm:$0xff]  ;;  %v1248_v18 = vld [vmem:[#allocation5 + $0x60] sm:$0xff]  ;;  %v1247_v21 = vld [vmem:[#allocation5 + $0x58] sm:$0xff] }
  0x13   :  { %130 = vmatpush.bf16.msra.mxu0 %v1242_v2  ;;  %v1246_v27 = vld [vmem:[#allocation5 + $0x50] sm:$0xff]  ;;  %v1245_v34 = vld [vmem:[#allocation5 + $0x48] sm:$0xff]  ;;  %v1244_v40 = vld [vmem:[#allocation5 + $0x40] sm:$0xff] }
  0x14   :  { %v1304_v55 = vld [vmem:[#allocation7] ss:$0 sm:$0xff]  ;;  %v1305_v58 = vld [vmem:[#allocation7 + $0x1] ss:$0 sm:$0xff]  ;;  %v1259_v63 = vld [vmem:[#allocation5 + $0xb8] sm:$0xff] }
  0x15   :  { %370 = vmatpush.bf16.msra.mxu2 %v1259_v63  ;;  %v1258_v0 = vld [vmem:[#allocation5 + $0xb0] sm:$0xff]  ;;  %v1257_v1 = vld [vmem:[#allocation5 + $0xa8] sm:$0xff]  ;;  %v1256_v2 = vld [vmem:[#allocation5 + $0xa0] sm:$0xff] }
  0x16   :  { %v1320_v15 = vpop.eup %1319  ;;  %254 = vmatpush.bf16.msra.mxu1 %v1250_v14 }
  0x17   :  { %131 = vmatpush.bf16.msra.mxu0 %v1241_v4  ;;  %v1454_v10 = vld [vmem:[#allocation2] sm:$0xff]  ;;  %v151_v17 = vmul.f32 8.0, %v1320_v15  ;;  %vm155_vm1 = vweird.f32 %v1320_v15  ;;  %v1255_v4 = vld [vmem:[#allocation5 + $0x98] sm:$0xff] }
  0x18   :  { %v80_v11 = vpack.c.bf16 %v1454_v10, %v1454_v10 }
  0x19   :  { %v152_v19 = vsub.f32 1.0, %v151_v17  ;;  %371 = vmatpush.bf16.msra.mxu2 %v1258_v0 }
  0x1a   :  { %255 = vmatpush.bf16.msra.mxu1 %v1249_v16  ;;  %v1253_v16 = vld [vmem:[#allocation5 + $0x88] sm:$0xff] }
  0x1b   :  { %132 = vmatpush.bf16.msra.mxu0 %v1240_v5  ;;  %v153_v24 = vmul.f32 %v1320_v15, %v152_v19 }
  0x1d   :  { %v154_v30 = vadd.f32 %v1320_v15, %v153_v24  ;;  %372 = vmatpush.bf16.msra.mxu2 %v1257_v1 }
  0x1e   :  { %256 = vmatpush.bf16.msra.mxu1 %v1248_v18 }
  0x1f   :  { %133 = vmatpush.bf16.msra.mxu0 %v1239_v6  ;;  %v1458_v37 = vsel %vm155_vm1, %v1320_v15, %v154_v30 }
  0x21   :  { %373 = vmatpush.bf16.msra.mxu2 %v1256_v2  ;;  %v1260_v2 = vld [vmem:[#allocation5 + $0xc0] sm:$0xff] }
  0x22   :  { %257 = vmatpush.bf16.msra.mxu1 %v1247_v21  ;;  %v1252_v21 = vld [vmem:[#allocation5 + $0x80] sm:$0xff] }
  0x23   :  { %134 = vmatpush.bf16.msra.mxu0 %v1238_v7 }
  0x25   :  { %374 = vmatpush.bf16.msra.mxu2 %v1255_v4 }
  0x26   :  { %258 = vmatpush.bf16.msra.mxu1 %v1246_v27 }
  0x27   :  { %135 = vmatpush.bf16.msra.mxu0 %v1237_v8 }
  0x2a   :  { %259 = vmatpush.bf16.msra.mxu1 %v1245_v34 }
  0x2b   :  { %136 = vmatpush.bf16.msra.mxu0 %v1236_v9  ;;  %v1254_v9 = vld [vmem:[#allocation5 + $0x90] sm:$0xff] }
  0x2c   :  { %375 = vmatpush.bf16.msra.mxu2 %v1254_v9  ;;  %v1275_v9 = vld [vmem:[#allocation5 + $0x138] sm:$0xff] }
  0x2e   :  { %137 = vmatmul.bf16.vlgmr.msra.gmra.mxu0 %v80_v11  ;;  %260 = vmatpush.bf16.msra.mxu1 %v1244_v40  ;;  %v1307_v40 = vld [vmem:[#allocation7 + $0x3] ss:$0 sm:$0xff] }
  0x2f   :  { %568 = vmatpush.bf16.msrb.mxu0 %v1275_v9 }
  0x30   :  { %376 = vmatpush.bf16.msra.mxu2 %v1253_v16 }
  0x34   :  { %377 = vmatpush.bf16.msra.mxu2 %v1252_v21  ;;  %v1270_v21 = vld [vmem:[#allocation5 + $0x110] sm:$0xff] }
  0xab   :  { %v138_v20 = vpop.f32.mrf.mxu0 }
  0xac   :  { %v144_v22 = vrot.slane %v138_v20, 4  ;;  %v158_v23 = vmul.f32 %v138_v20, %v138_v20 }
  0xae   :  { %v145_v25 = vadd.f32 %v144_v22, %v138_v20  ;;  %v159_v26 = vrot.slane %v158_v23, 4 }
  0xb0   :  { %v146_v28 = vrot.slane %v145_v25, 2  ;;  %v160_v29 = vadd.f32 %v159_v26, %v158_v23 }
  0xb2   :  { %v147_v31 = vadd.f32 %v146_v28, %v145_v25  ;;  %v161_v32 = vrot.slane %v160_v29, 2 }
  0xb3   :  { %v140_v33 = vpop.f32.mrf.mxu0 }
  0xb4   :  { %v148_v35 = vrot.slane %v147_v31, 1  ;;  %v162_v36 = vadd.f32 %v161_v32, %v160_v29 }
  0xb6   :  { %v149_v38 = vadd.f32 %v148_v35, %v147_v31  ;;  %v163_v39 = vrot.slane %v162_v36, 1 }
  0xb8   :  { %v157_v41 = vmul.f32 %v1458_v37, %v149_v38  ;;  %v164_v42 = vadd.f32 %v163_v39, %v162_v36  ;;  %v1306_v36 = vld [vmem:[#allocation7 + $0x2] ss:$0 sm:$0xff] }
  0xba   :  { %v165_v43 = vmul.f32 %v164_v42, %v1458_v37  ;;  %v166_v44 = vmul.f32 %v157_v41, %v157_v41  ;;  %v169_v54 = vsub.f32 %v138_v20, %v157_v41 }
  0xbc   :  { %v167_v45 = vsub.f32 %v165_v43, %v166_v44 }
  0xbe   :  { %v168_v46 = vmax.f32 %v167_v45, 0.0  ;;  %v1267_v45 = vld [vmem:[#allocation5 + $0xf8] sm:$0xff] }
  0xbf   :  { %489 = vmatpush.bf16.msra.mxu3 %v1267_v45 }
  0xc0   :  { %v170_v47 = vadd.f32 1e-05, %v168_v46  ;;  %v1266_v46 = vld [vmem:[#allocation5 + $0xf0] sm:$0xff] }
  0xc2   :  { %1321 = vrsqrt.f32 %v170_v47  ;;  %vm177_vm3 = vweird.f32 %v170_v47 }
  0xc3   :  { %490 = vmatpush.bf16.msra.mxu3 %v1266_v46 }
  0xc8   :  { %v1322_v48 = vpop.eup %1321 }
  0xc9   :  { %v172_v49 = vmul.f32 %v1322_v48, %v170_v47  ;;  %vm178_vm2 = vweird.f32 %v1322_v48  ;;  %v1265_v47 = vld [vmem:[#allocation5 + $0xe8] sm:$0xff] }
  0xca   :  { %vm179_vm4 = vmor %vm177_vm3, %vm178_vm2  ;;  %491 = vmatpush.bf16.msra.mxu3 %v1265_v47  ;;  %v1281_v47 = vld [vmem:[#allocation5 + $0x168] sm:$0xff] }
  0xcb   :  { %v173_v50 = vmul.f32 %v1322_v48, %v172_v49 }
  0xcd   :  { %v174_v51 = vmul.f32 0.5, %v173_v50  ;;  %v1263_v50 = vld [vmem:[#allocation5 + $0xd8] sm:$0xff] }
  0xcf   :  { %v175_v52 = vsub.f32 1.5, %v174_v51 }
  0xd1   :  { %v176_v53 = vmul.f32 %v1322_v48, %v175_v52 }
  0xd3   :  { %v180_v56 = vsel %vm179_vm4, %v1322_v48, %v176_v53  ;;  %v1264_v48 = vld [vmem:[#allocation5 + $0xe0] sm:$0xff] }
  0xd4   :  { %v181_v57 = vmul.f32 %v180_v56, %v169_v54  ;;  %492 = vmatpush.bf16.msra.mxu3 %v1264_v48 }
  0xd6   :  { %v183_v59 = vmul.f32 %v1304_v55, %v181_v57  ;;  %v1262_v55 = vld [vmem:[#allocation5 + $0xd0] sm:$0xff] }
  0xd8   :  { %v185_v60 = vadd.f32 %v1305_v58, %v183_v59  ;;  %493 = vmatpush.bf16.msra.mxu3 %v1263_v50 }
  0xda   :  { %v186_v61 = vmax.f32 %v185_v60, 0.0 }
  0xdc   :  { %v204_v62 = vpack.c.bf16 %v186_v61, %v186_v61  ;;  %494 = vmatpush.bf16.msra.mxu3 %v1262_v55  ;;  %v1261_v61 = vld [vmem:[#allocation5 + $0xc8] sm:$0xff] }
  0xde   :  { %261 = vmatmul.bf16.vlgmr.msra.gmra.mxu1 %v204_v62 }
  0xe0   :  { %495 = vmatpush.bf16.msra.mxu3 %v1261_v61  ;;  %v1279_v61 = vld [vmem:[#allocation5 + $0x158] sm:$0xff] }
  0xe4   :  { %496 = vmatpush.bf16.msra.mxu3 %v1260_v2 }
 0x15b   :  { %v262_v3 = vpop.f32.mrf.mxu1 }
 0x15c   :  { %v268_v5 = vrot.slane %v262_v3, 4  ;;  %v275_v6 = vmul.f32 %v262_v3, %v262_v3 }
 0x15e   :  { %v269_v7 = vadd.f32 %v268_v5, %v262_v3  ;;  %v276_v8 = vrot.slane %v275_v6, 4 }
 0x160   :  { %v270_v11 = vrot.slane %v269_v7, 2  ;;  %v277_v12 = vadd.f32 %v276_v8, %v275_v6 }
 0x162   :  { %v271_v13 = vadd.f32 %v270_v11, %v269_v7  ;;  %v278_v14 = vrot.slane %v277_v12, 2 }
 0x163   :  { %v264_v15 = vpop.f32.mrf.mxu1 }
 0x164   :  { %v272_v17 = vrot.slane %v271_v13, 1  ;;  %v279_v18 = vadd.f32 %v278_v14, %v277_v12  ;;  %v1274_v12 = vld [vmem:[#allocation5 + $0x130] sm:$0xff]  ;;  %v1272_v15 = vld [vmem:[#allocation5 + $0x120] sm:$0xff] }
 0x165   :  { %569 = vmatpush.bf16.msrb.mxu0 %v1274_v12 }
 0x166   :  { %v273_v19 = vadd.f32 %v272_v17, %v271_v13  ;;  %v280_v20 = vrot.slane %v279_v18, 1  ;;  %v1273_v13 = vld [vmem:[#allocation5 + $0x128] sm:$0xff] }
 0x168   :  { %v274_v22 = vmul.f32 %v273_v19, %v1458_v37  ;;  %v281_v23 = vadd.f32 %v280_v20, %v279_v18  ;;  %v1271_v18 = vld [vmem:[#allocation5 + $0x118] sm:$0xff] }
 0x169   :  { %570 = vmatpush.bf16.msrb.mxu0 %v1273_v13  ;;  %v1277_v13 = vld [vmem:[#allocation5 + $0x148] sm:$0xff] }
 0x16a   :  { %v282_v24 = vmul.f32 %v281_v23, %v1458_v37  ;;  %v283_v25 = vmul.f32 %v274_v22, %v274_v22  ;;  %v286_v35 = vsub.f32 %v262_v3, %v274_v22 }
 0x16c   :  { %v284_v26 = vsub.f32 %v282_v24, %v283_v25  ;;  %v1308_v24 = vld [vmem:[#allocation7 + $0x4] ss:$0 sm:$0xff] }
 0x16d   :  { %571 = vmatpush.bf16.msrb.mxu0 %v1272_v15 }
 0x16e   :  { %v285_v27 = vmax.f32 %v284_v26, 0.0 }
 0x170   :  { %v287_v28 = vadd.f32 1e-05, %v285_v27  ;;  %v1309_v27 = vld [vmem:[#allocation7 + $0x5] ss:$0 sm:$0xff] }
 0x171   :  { %572 = vmatpush.bf16.msrb.mxu0 %v1271_v18 }
 0x172   :  { %1323 = vrsqrt.f32 %v287_v28  ;;  %vm294_vm6 = vweird.f32 %v287_v28 }
 0x175   :  { %573 = vmatpush.bf16.msrb.mxu0 %v1270_v21 }
 0x178   :  { %v1324_v29 = vpop.eup %1323 }
 0x179   :  { %v289_v30 = vmul.f32 %v1324_v29, %v287_v28  ;;  %vm295_vm5 = vweird.f32 %v1324_v29  ;;  %v1269_v28 = vld [vmem:[#allocation5 + $0x108] sm:$0xff] }
 0x17a   :  { %vm296_vm7 = vmor %vm294_vm6, %vm295_vm5  ;;  %574 = vmatpush.bf16.msrb.mxu0 %v1269_v28 }
 0x17b   :  { %v290_v31 = vmul.f32 %v1324_v29, %v289_v30 }
 0x17d   :  { %v291_v32 = vmul.f32 0.5, %v290_v31 }
 0x17f   :  { %v292_v33 = vsub.f32 1.5, %v291_v32 }
 0x181   :  { %v293_v34 = vmul.f32 %v1324_v29, %v292_v33  ;;  %v1268_v33 = vld [vmem:[#allocation5 + $0x100] sm:$0xff] }
 0x182   :  { %575 = vmatpush.bf16.msrb.mxu0 %v1268_v33 }
 0x183   :  { %v297_v38 = vsel %vm296_vm7, %v1324_v29, %v293_v34  ;;  %v1310_v34 = vld [vmem:[#allocation7 + $0x6] ss:$0 sm:$0xff] }
 0x184   :  { %v298_v39 = vmul.f32 %v297_v38, %v286_v35 }
 0x186   :  { %v300_v41 = vmul.f32 %v1306_v36, %v298_v39 }
 0x188   :  { %v302_v42 = vadd.f32 %v1307_v40, %v300_v41  ;;  %v1283_v40 = vld [vmem:[#allocation5 + $0x178] sm:$0xff]  ;;  %v1282_v41 = vld [vmem:[#allocation5 + $0x170] sm:$0xff] }
 0x189   :  { %729 = vmatpush.bf16.msrb.mxu1 %v1283_v40 }
 0x18a   :  { %v303_v43 = vmax.f32 %v302_v42, 0.0 }
 0x18c   :  { %v321_v44 = vpack.c.bf16 %v303_v43, %v303_v43 }
 0x18d   :  { %730 = vmatpush.bf16.msrb.mxu1 %v1282_v41 }
 0x18e   :  { %378 = vmatmul.bf16.vlgmr.msra.gmra.mxu2 %v321_v44 }
 0x191   :  { %731 = vmatpush.bf16.msrb.mxu1 %v1281_v47 }
 0x211   :  { %v379_v49 = vpop.f32.mrf.mxu2 }
 0x212   :  { %v385_v51 = vrot.slane %v379_v49, 4  ;;  %v392_v52 = vmul.f32 %v379_v49, %v379_v49 }
 0x214   :  { %v386_v53 = vadd.f32 %v385_v51, %v379_v49  ;;  %v393_v54 = vrot.slane %v392_v52, 4  ;;  %v1280_v51 = vld [vmem:[#allocation5 + $0x160] sm:$0xff] }
 0x215   :  { %732 = vmatpush.bf16.msrb.mxu1 %v1280_v51 }
 0x216   :  { %v387_v56 = vrot.slane %v386_v53, 2  ;;  %v394_v57 = vadd.f32 %v393_v54, %v392_v52 }
 0x218   :  { %v388_v58 = vadd.f32 %v387_v56, %v386_v53  ;;  %v395_v59 = vrot.slane %v394_v57, 2 }
 0x219   :  { %v381_v60 = vpop.f32.mrf.mxu2  ;;  %733 = vmatpush.bf16.msrb.mxu1 %v1279_v61 }
 0x21a   :  { %v389_v62 = vrot.slane %v388_v58, 1  ;;  %v396_v63 = vadd.f32 %v395_v59, %v394_v57 }
 0x21c   :  { %v390_v0 = vadd.f32 %v389_v62, %v388_v58  ;;  %v397_v1 = vrot.slane %v396_v63, 1 }
 0x21e   :  { %v391_v3 = vmul.f32 %v390_v0, %v1458_v37  ;;  %v398_v4 = vadd.f32 %v397_v1, %v396_v63 }
 0x220   :  { %v399_v5 = vmul.f32 %v398_v4, %v1458_v37  ;;  %v400_v6 = vmul.f32 %v391_v3, %v391_v3  ;;  %v403_v23 = vsub.f32 %v379_v49, %v391_v3 }
 0x222   :  { %v401_v7 = vsub.f32 %v399_v5, %v400_v6  ;;  %v1278_v5 = vld [vmem:[#allocation5 + $0x150] sm:$0xff] }
 0x223   :  { %734 = vmatpush.bf16.msrb.mxu1 %v1278_v5 }
 0x224   :  { %v402_v8 = vmax.f32 %v401_v7, 0.0 }
 0x226   :  { %v404_v11 = vadd.f32 1e-05, %v402_v8 }
 0x227   :  { %735 = vmatpush.bf16.msrb.mxu1 %v1277_v13 }
 0x228   :  { %1325 = vrsqrt.f32 %v404_v11  ;;  %vm411_vm9 = vweird.f32 %v404_v11 }
 0x22e   :  { %v1326_v14 = vpop.eup %1325 }
 0x22f   :  { %v406_v16 = vmul.f32 %v1326_v14, %v404_v11  ;;  %vm412_vm8 = vweird.f32 %v1326_v14 }
 0x230   :  { %vm413_vm10 = vmor %vm411_vm9, %vm412_vm8 }
 0x231   :  { %v407_v17 = vmul.f32 %v1326_v14, %v406_v16 }
 0x233   :  { %v408_v19 = vmul.f32 0.5, %v407_v17  ;;  %v1276_v17 = vld [vmem:[#allocation5 + $0x140] sm:$0xff] }
 0x234   :  { %736 = vmatpush.bf16.msrb.mxu1 %v1276_v17 }
 0x235   :  { %v409_v20 = vsub.f32 1.5, %v408_v19 }
 0x237   :  { %v410_v22 = vmul.f32 %v1326_v14, %v409_v20 }
 0x239   :  { %v414_v25 = vsel %vm413_vm10, %v1326_v14, %v410_v22 }
 0x23a   :  { %v415_v26 = vmul.f32 %v414_v25, %v403_v23 }
 0x23c   :  { %v417_v29 = vmul.f32 %v1308_v24, %v415_v26 }
 0x23e   :  { %v419_v30 = vadd.f32 %v1309_v27, %v417_v29 }
 0x240   :  { %v420_v31 = vmax.f32 %v419_v30, 0.0 }
 0x242   :  { %v421_v32 = vpack.c.bf16 %v420_v31, %v420_v31 }
 0x244   :  { %497 = vmatmul.bf16.vlgmr.msra.gmra.mxu3 %v421_v32 }
 0x2c7   :  { %v498_v35 = vpop.f32.mrf.mxu3 }
 0x2c8   :  { %v1466_v36 = vadd.f32 %v1310_v34, %v498_v35 }
 0x2ca   :  { %v519_v38 = vpack.c.bf16 %v1454_v10, %v1466_v36 }
 0x2cc   :  { %576 = vmatmul.bf16.vlgmr.msrb.gmra.mxu0 %v519_v38 }
 0x2cf   :  { %v500_v39 = vpop.f32.mrf.mxu3 }
 0x2d0   :  { %v1311_v39 = vld [vmem:[#allocation7 + $0x7] ss:$0 sm:$0xff] }
 0x349   :  { %v1470_v42 = vpop.f32.mrf.mxu0 }
 0x34a   :  { %v584_v43 = vrot.slane %v1470_v42, 4  ;;  %v591_v44 = vmul.f32 %v1470_v42, %v1470_v42 }
 0x34c   :  { %v585_v45 = vadd.f32 %v584_v43, %v1470_v42  ;;  %v592_v46 = vrot.slane %v591_v44, 4 }
 0x34e   :  { %v586_v48 = vrot.slane %v585_v45, 2  ;;  %v593_v49 = vadd.f32 %v592_v46, %v591_v44 }
 0x350   :  { %v587_v10 = vadd.f32 %v586_v48, %v585_v45  ;;  %v594_v50 = vrot.slane %v593_v49, 2  ;;  %v1312_v45 = vld [vmem:[#allocation7 + $0x8] ss:$0 sm:$0xff] }
 0x351   :  { %v1476_v52 = vpop.f32.mrf.mxu0 }
 0x352   :  { %v588_v53 = vrot.slane %v587_v10, 1  ;;  %v595_v54 = vadd.f32 %v594_v50, %v593_v49  ;;  %v613_v55 = vrot.slane %v1476_v52, 4  ;;  %v620_v56 = vmul.f32 %v1476_v52, %v1476_v52 }
 0x354   :  { %v589_v57 = vadd.f32 %v588_v53, %v587_v10  ;;  %v596_v58 = vrot.slane %v595_v54, 1  ;;  %v614_v59 = vadd.f32 %v613_v55, %v1476_v52  ;;  %v621_v60 = vrot.slane %v620_v56, 4  ;;  %v1291_v53 = vld [vmem:[#allocation5 + $0x1b8] sm:$0xff] }
 0x355   :  { %885 = vmatpush.bf16.msrb.mxu2 %v1291_v53 }
 0x356   :  { %v590_v62 = vmul.f32 %v589_v57, %v1458_v37  ;;  %v597_v63 = vadd.f32 %v596_v58, %v595_v54  ;;  %v615_v0 = vrot.slane %v614_v59, 2  ;;  %v622_v1 = vadd.f32 %v621_v60, %v620_v56  ;;  %v1290_v54 = vld [vmem:[#allocation5 + $0x1b0] sm:$0xff] }
 0x358   :  { %v598_v2 = vmul.f32 %v597_v63, %v1458_v37  ;;  %v599_v3 = vmul.f32 %v590_v62, %v590_v62  ;;  %v616_v4 = vadd.f32 %v615_v0, %v614_v59  ;;  %v623_v6 = vrot.slane %v622_v1, 2  ;;  %v1289_v59 = vld [vmem:[#allocation5 + $0x1a8] sm:$0xff]  ;;  %v1288_v0 = vld [vmem:[#allocation5 + $0x1a0] sm:$0xff] }
 0x359   :  { %v651_v34 = vsub.f32 %v1470_v42, %v590_v62  ;;  %886 = vmatpush.bf16.msrb.mxu2 %v1290_v54 }
 0x35a   :  { %v600_v7 = vsub.f32 %v598_v2, %v599_v3  ;;  %v617_v8 = vrot.slane %v616_v4, 1  ;;  %v624_v9 = vadd.f32 %v623_v6, %v622_v1 }
 0x35c   :  { %v601_v11 = vmax.f32 %v600_v7, 0.0  ;;  %v618_v12 = vadd.f32 %v617_v8, %v616_v4  ;;  %v625_v14 = vrot.slane %v624_v9, 1 }
 0x35d   :  { %887 = vmatpush.bf16.msrb.mxu2 %v1289_v59 }
 0x35e   :  { %v602_v15 = vadd.f32 1e-05, %v601_v11  ;;  %v619_v16 = vmul.f32 %v618_v12, %v1458_v37  ;;  %v626_v18 = vadd.f32 %v625_v14, %v624_v9  ;;  %v1287_v11 = vld [vmem:[#allocation5 + $0x198] sm:$0xff] }
 0x360   :  { %1327 = vrsqrt.f32 %v602_v15  ;;  %v628_v19 = vmul.f32 %v619_v16, %v619_v16  ;;  %v627_v20 = vmul.f32 %v626_v18, %v1458_v37  ;;  %vm609_vm12 = vweird.f32 %v602_v15 }
 0x361   :  { %v652_v43 = vsub.f32 %v1476_v52, %v619_v16  ;;  %888 = vmatpush.bf16.msrb.mxu2 %v1288_v0 }
 0x362   :  { %v629_v21 = vsub.f32 %v627_v20, %v628_v19  ;;  %v1286_v19 = vld [vmem:[#allocation5 + $0x190] sm:$0xff] }
 0x364   :  { %v630_v22 = vmax.f32 %v629_v21, 0.0 }
 0x365   :  { %889 = vmatpush.bf16.msrb.mxu2 %v1287_v11 }
 0x366   :  { %v1328_v23 = vpop.eup %1327  ;;  %v631_v25 = vadd.f32 1e-05, %v630_v22 }
 0x367   :  { %v604_v24 = vmul.f32 %v1328_v23, %v602_v15  ;;  %vm610_vm11 = vweird.f32 %v1328_v23 }
 0x368   :  { %1329 = vrsqrt.f32 %v631_v25  ;;  %vm611_vm13 = vmor %vm609_vm12, %vm610_vm11  ;;  %vm638_vm15 = vweird.f32 %v631_v25 }
 0x369   :  { %v605_v26 = vmul.f32 %v1328_v23, %v604_v24  ;;  %890 = vmatpush.bf16.msrb.mxu2 %v1286_v19 }
 0x36b   :  { %v606_v27 = vmul.f32 0.5, %v605_v26  ;;  %v1285_v26 = vld [vmem:[#allocation5 + $0x188] sm:$0xff] }
 0x36d   :  { %v607_v28 = vsub.f32 1.5, %v606_v27  ;;  %891 = vmatpush.bf16.msrb.mxu2 %v1285_v26 }
 0x36e   :  { %v1330_v29 = vpop.eup %1329 }
 0x36f   :  { %v608_v30 = vmul.f32 %v1328_v23, %v607_v28  ;;  %v633_v31 = vmul.f32 %v1330_v29, %v631_v25  ;;  %vm639_vm14 = vweird.f32 %v1330_v29 }
 0x370   :  { %vm640_vm0 = vmor %vm638_vm15, %vm639_vm14 }
 0x371   :  { %v612_v32 = vsel %vm611_vm13, %v1328_v23, %v608_v30  ;;  %v634_v33 = vmul.f32 %v1330_v29, %v633_v31  ;;  %v1284_v30 = vld [vmem:[#allocation5 + $0x180] sm:$0xff] }
 0x372   :  { %v653_v38 = vmul.f32 %v651_v34, %v612_v32  ;;  %892 = vmatpush.bf16.msrb.mxu2 %v1284_v30 }
 0x373   :  { %v635_v35 = vmul.f32 0.5, %v634_v33 }
 0x374   :  { %v656_v44 = vmul.f32 %v1311_v39, %v653_v38 }
 0x375   :  { %v636_v40 = vsub.f32 1.5, %v635_v35 }
 0x376   :  { %v659_v49 = vadd.f32 %v1312_v45, %v656_v44 }
 0x377   :  { %v637_v41 = vmul.f32 %v1330_v29, %v636_v40 }
 0x378   :  { %v661_v50 = vmax.f32 %v659_v49, 0.0 }
 0x379   :  { %v641_v46 = vsel %vm640_vm0, %v1330_v29, %v637_v41 }
 0x37a   :  { %v654_v47 = vmul.f32 %v652_v43, %v641_v46 }
 0x37c   :  { %v657_v48 = vmul.f32 %v1311_v39, %v654_v47 }
 0x37e   :  { %v660_v10 = vadd.f32 %v1312_v45, %v657_v48 }
 0x380   :  { %v662_v51 = vmax.f32 %v660_v10, 0.0 }
 0x382   :  { %v680_v42 = vpack.c.bf16 %v662_v51, %v661_v50 }
 0x384   :  { %737 = vmatmul.bf16.vlgmr.msrb.gmra.mxu1 %v680_v42  ;;  %v1313_v42 = vld [vmem:[#allocation7 + $0x9] ss:$0 sm:$0xff] }
 0x401   :  { %v1488_v55 = vpop.f32.mrf.mxu1 }
 0x402   :  { %v745_v56 = vrot.slane %v1488_v55, 4  ;;  %v752_v52 = vmul.f32 %v1488_v55, %v1488_v55 }
 0x404   :  { %v746_v57 = vadd.f32 %v745_v56, %v1488_v55  ;;  %v753_v58 = vrot.slane %v752_v52, 4 }
 0x406   :  { %v747_v60 = vrot.slane %v746_v57, 2  ;;  %v754_v61 = vadd.f32 %v753_v58, %v752_v52 }
 0x408   :  { %v748_v62 = vadd.f32 %v747_v60, %v746_v57  ;;  %v755_v63 = vrot.slane %v754_v61, 2  ;;  %v1314_v57 = vld [vmem:[#allocation7 + $0xa] ss:$0 sm:$0xff] }
 0x409   :  { %v1494_v1 = vpop.f32.mrf.mxu1 }
 0x40a   :  { %v749_v2 = vrot.slane %v748_v62, 1  ;;  %v756_v3 = vadd.f32 %v755_v63, %v754_v61  ;;  %v774_v4 = vrot.slane %v1494_v1, 4  ;;  %v781_v5 = vmul.f32 %v1494_v1, %v1494_v1 }
 0x40c   :  { %v750_v6 = vadd.f32 %v749_v2, %v748_v62  ;;  %v757_v7 = vrot.slane %v756_v3, 1  ;;  %v775_v8 = vadd.f32 %v774_v4, %v1494_v1  ;;  %v782_v9 = vrot.slane %v781_v5, 4 }
 0x40e   :  { %v751_v12 = vmul.f32 %v750_v6, %v1458_v37  ;;  %v758_v13 = vadd.f32 %v757_v7, %v756_v3  ;;  %v776_v14 = vrot.slane %v775_v8, 2  ;;  %v783_v15 = vadd.f32 %v782_v9, %v781_v5 }
 0x410   :  { %v759_v16 = vmul.f32 %v758_v13, %v1458_v37  ;;  %v760_v17 = vmul.f32 %v751_v12, %v751_v12  ;;  %v777_v18 = vadd.f32 %v776_v14, %v775_v8  ;;  %v784_v20 = vrot.slane %v783_v15, 2 }
 0x411   :  { %v807_v10 = vsub.f32 %v1488_v55, %v751_v12 }
 0x412   :  { %v761_v21 = vsub.f32 %v759_v16, %v760_v17  ;;  %v778_v22 = vrot.slane %v777_v18, 1  ;;  %v785_v23 = vadd.f32 %v784_v20, %v783_v15 }
 0x414   :  { %v762_v24 = vmax.f32 %v761_v21, 0.0  ;;  %v779_v25 = vadd.f32 %v778_v22, %v777_v18  ;;  %v786_v27 = vrot.slane %v785_v23, 1 }
 0x416   :  { %v763_v28 = vadd.f32 1e-05, %v762_v24  ;;  %v780_v29 = vmul.f32 %v779_v25, %v1458_v37  ;;  %v787_v31 = vadd.f32 %v786_v27, %v785_v23 }
 0x418   :  { %1331 = vrsqrt.f32 %v763_v28  ;;  %v789_v32 = vmul.f32 %v780_v29, %v780_v29  ;;  %v788_v33 = vmul.f32 %v787_v31, %v1458_v37  ;;  %vm770_vm2 = vweird.f32 %v763_v28 }
 0x419   :  { %v808_v56 = vsub.f32 %v1494_v1, %v780_v29 }
 0x41a   :  { %v790_v34 = vsub.f32 %v788_v33, %v789_v32 }
 0x41c   :  { %v791_v35 = vmax.f32 %v790_v34, 0.0 }
 0x41e   :  { %v1332_v38 = vpop.eup %1331  ;;  %v792_v40 = vadd.f32 1e-05, %v791_v35 }
 0x41f   :  { %v765_v39 = vmul.f32 %v1332_v38, %v763_v28  ;;  %vm771_vm1 = vweird.f32 %v1332_v38 }
 0x420   :  { %1333 = vrsqrt.f32 %v792_v40  ;;  %vm772_vm3 = vmor %vm770_vm2, %vm771_vm1  ;;  %vm799_vm5 = vweird.f32 %v792_v40 }
 0x421   :  { %v766_v41 = vmul.f32 %v1332_v38, %v765_v39 }
 0x423   :  { %v767_v43 = vmul.f32 0.5, %v766_v41 }
 0x425   :  { %v768_v44 = vsub.f32 1.5, %v767_v43 }
 0x426   :  { %v1334_v45 = vpop.eup %1333 }
 0x427   :  { %v769_v46 = vmul.f32 %v1332_v38, %v768_v44  ;;  %v794_v47 = vmul.f32 %v1334_v45, %v792_v40  ;;  %vm800_vm4 = vweird.f32 %v1334_v45 }
 0x428   :  { %vm801_vm6 = vmor %vm799_vm5, %vm800_vm4 }
 0x429   :  { %v773_v48 = vsel %vm772_vm3, %v1332_v38, %v769_v46  ;;  %v795_v49 = vmul.f32 %v1334_v45, %v794_v47 }
 0x42a   :  { %v809_v51 = vmul.f32 %v807_v10, %v773_v48 }
 0x42b   :  { %v796_v50 = vmul.f32 0.5, %v795_v49 }
 0x42c   :  { %v812_v52 = vmul.f32 %v1313_v42, %v809_v51 }
 0x42d   :  { %v797_v53 = vsub.f32 1.5, %v796_v50 }
 0x42e   :  { %v815_v61 = vadd.f32 %v1314_v57, %v812_v52  ;;  %v1316_v52 = vld [vmem:[#allocation7 + $0xc] ss:$0 sm:$0xff] }
 0x42f   :  { %v798_v54 = vmul.f32 %v1334_v45, %v797_v53  ;;  %v1315_v53 = vld [vmem:[#allocation7 + $0xb] ss:$0 sm:$0xff] }
 0x430   :  { %v817_v63 = vmax.f32 %v815_v61, 0.0  ;;  %v1317_v61 = vld [vmem:[#allocation7 + $0xd] ss:$0 sm:$0xff] }
 0x431   :  { %v802_v58 = vsel %vm801_vm6, %v1334_v45, %v798_v54 }
 0x432   :  { %v810_v59 = vmul.f32 %v808_v56, %v802_v58 }
 0x434   :  { %v813_v60 = vmul.f32 %v1313_v42, %v810_v59 }
 0x436   :  { %v816_v62 = vadd.f32 %v1314_v57, %v813_v60 }
 0x438   :  { %v818_v0 = vmax.f32 %v816_v62, 0.0 }
 0x43a   :  { %v836_v55 = vpack.c.bf16 %v818_v0, %v817_v63 }
 0x43c   :  { %893 = vmatmul.bf16.vlgmr.msrb.gmra.mxu2 %v836_v55 }
 0x4bf   :  { %v894_v2 = vpop.f32.mrf.mxu2 }
 0x4c0   :  { %v901_v3 = vrot.slane %v894_v2, 4  ;;  %v908_v4 = vmul.f32 %v894_v2, %v894_v2 }
 0x4c2   :  { %v902_v5 = vadd.f32 %v901_v3, %v894_v2  ;;  %v909_v6 = vrot.slane %v908_v4, 4 }
 0x4c4   :  { %v903_v7 = vrot.slane %v902_v5, 2  ;;  %v910_v8 = vadd.f32 %v909_v6, %v908_v4 }
 0x4c6   :  { %v904_v9 = vadd.f32 %v903_v7, %v902_v5  ;;  %v911_v1 = vrot.slane %v910_v8, 2 }
 0x4c7   :  { %v1506_v11 = vpop.f32.mrf.mxu2 }
 0x4c8   :  { %v905_v12 = vrot.slane %v904_v9, 1  ;;  %v912_v13 = vadd.f32 %v911_v1, %v910_v8  ;;  %v930_v14 = vrot.slane %v1506_v11, 4  ;;  %v937_v15 = vmul.f32 %v1506_v11, %v1506_v11 }
 0x4c9   :  { %v1424_v8 = vmov 0  }
 0x4ca   :  { %v906_v16 = vadd.f32 %v905_v12, %v904_v9  ;;  %v913_v17 = vrot.slane %v912_v13, 1  ;;  %v931_v18 = vadd.f32 %v930_v14, %v1506_v11  ;;  %v938_v19 = vrot.slane %v937_v15, 4  ;;  %1302 = vset.pattern.permute.xlu1 %v1424_v8  ;;  %1303 = vset.pattern.permute.xlu0 %v1424_v8  ;;  %v1318_v9 = vld [vmem:[#allocation7 + $0xe] ss:$0 sm:$0xff] }
 0x4cc   :  { %v907_v20 = vmul.f32 %v906_v16, %v1458_v37  ;;  %v914_v21 = vadd.f32 %v913_v17, %v912_v13  ;;  %v932_v22 = vrot.slane %v931_v18, 2  ;;  %v939_v23 = vadd.f32 %v938_v19, %v937_v15 }
 0x4ce   :  { %v915_v24 = vmul.f32 %v914_v21, %v1458_v37  ;;  %v916_v25 = vmul.f32 %v907_v20, %v907_v20  ;;  %v933_v26 = vadd.f32 %v932_v22, %v931_v18  ;;  %v940_v27 = vrot.slane %v939_v23, 2 }
 0x4cf   :  { %v963_v51 = vsub.f32 %v894_v2, %v907_v20 }
 0x4d0   :  { %v917_v28 = vsub.f32 %v915_v24, %v916_v25  ;;  %v934_v29 = vrot.slane %v933_v26, 1  ;;  %v941_v30 = vadd.f32 %v940_v27, %v939_v23 }
 0x4d2   :  { %v918_v31 = vmax.f32 %v917_v28, 0.0  ;;  %v935_v32 = vadd.f32 %v934_v29, %v933_v26  ;;  %v942_v33 = vrot.slane %v941_v30, 1 }
 0x4d4   :  { %v919_v34 = vadd.f32 1e-05, %v918_v31  ;;  %v936_v35 = vmul.f32 %v935_v32, %v1458_v37  ;;  %v943_v38 = vadd.f32 %v942_v33, %v941_v30 }
 0x4d6   :  { %1335 = vrsqrt.f32 %v919_v34  ;;  %v945_v39 = vmul.f32 %v936_v35, %v936_v35  ;;  %v944_v40 = vmul.f32 %v943_v38, %v1458_v37  ;;  %vm926_vm8 = vweird.f32 %v919_v34 }
 0x4d7   :  { %v964_v0 = vsub.f32 %v1506_v11, %v936_v35  ;;  %v987_v11 = vlaneseq }
 0x4d8   :  { %v946_v41 = vsub.f32 %v944_v40, %v945_v39 }
 0x4d9   :  { %v988_v15 = vand.u32 127, %v987_v11 }
 0x4da   :  { %v947_v43 = vmax.f32 %v946_v41, 0.0 }
 0x4db   :  { %vm989_vm13 = vcmp.eq.s32.totalorder %v988_v15, 32  ;;  %vm997_vm14 = vcmp.eq.s32.totalorder %v988_v15, 33 }
 0x4dc   :  { %v1336_v44 = vpop.eup %1335  ;;  %v948_v45 = vadd.f32 1e-05, %v947_v43 }
 0x4dd   :  { %v921_v46 = vmul.f32 %v1336_v44, %v919_v34  ;;  %vm927_vm7 = vweird.f32 %v1336_v44 }
 0x4de   :  { %1337 = vrsqrt.f32 %v948_v45  ;;  %vm928_vm9 = vmor %vm926_vm8, %vm927_vm7  ;;  %vm955_vm11 = vweird.f32 %v948_v45 }
 0x4df   :  { %v922_v47 = vmul.f32 %v1336_v44, %v921_v46 }
 0x4e1   :  { %v923_v48 = vmul.f32 0.5, %v922_v47 }
 0x4e3   :  { %v924_v49 = vsub.f32 1.5, %v923_v48 }
 0x4e4   :  { %v1338_v10 = vpop.eup %1337 }
 0x4e5   :  { %v925_v50 = vmul.f32 %v1336_v44, %v924_v49  ;;  %v950_v42 = vmul.f32 %v1338_v10, %v948_v45  ;;  %vm956_vm10 = vweird.f32 %v1338_v10 }
 0x4e6   :  { %vm957_vm12 = vmor %vm955_vm11, %vm956_vm10 }
 0x4e7   :  { %v929_v54 = vsel %vm928_vm9, %v1336_v44, %v925_v50  ;;  %v951_v56 = vmul.f32 %v1338_v10, %v950_v42 }
 0x4e8   :  { %v965_v37 = vmul.f32 %v963_v51, %v929_v54 }
 0x4e9   :  { %v952_v57 = vmul.f32 0.5, %v951_v56 }
 0x4ea   :  { %v968_v58 = vmul.f32 %v1315_v53, %v965_v37 }
 0x4eb   :  { %v953_v59 = vsub.f32 1.5, %v952_v57 }
 0x4ec   :  { %v971_v60 = vadd.f32 %v1316_v52, %v968_v58 }
 0x4ed   :  { %v954_v62 = vmul.f32 %v1338_v10, %v953_v59 }
 0x4ee   :  { %v973_v63 = vmax.f32 %v971_v60, 0.0 }
 0x4ef   :  { %v958_v55 = vsel %vm957_vm12, %v1338_v10, %v954_v62 }
 0x4f0   :  { %v978_v2 = vmul.f32 %v1317_v61, %v973_v63  ;;  %v966_v3 = vmul.f32 %v964_v0, %v958_v55 }
 0x4f2   :  { %980 = vadd.xlane.f32.xlu0 %v978_v2  ;;  %v969_v4 = vmul.f32 %v1315_v53, %v966_v3 }
 0x4f4   :  { %v972_v5 = vadd.f32 %v1316_v52, %v969_v4 }
 0x4f6   :  { %v974_v6 = vmax.f32 %v972_v5, 0.0 }
 0x4f8   :  { %v979_v7 = vmul.f32 %v1317_v61, %v974_v6 }
 0x4fa   :  { %982 = vadd.xlane.f32.xlu0 %v979_v7 }
 0x565   :  { %v981_v1 = vpop.xlane.xlu0 %980 }
 0x566   :  { %v985_v12 = vadd.f32 %v1318_v9, %v981_v1 }
 0x568   :  { %992 = vperm.xlu1 %1302, %v985_v12  }
 0x56d   :  { %v983_v13 = vpop.xlane.xlu0 %982 }
 0x56e   :  { %v986_v14 = vadd.f32 %v1318_v9, %v983_v13 }
 0x570   :  { %1000 = vperm.xlu1 %1302, %v986_v14  }
 0x5da   :  { %v993_v16 = vpop.permute.xlu1 %992 }
 0x5db   :  { %v995_v17 = vsel %vm989_vm13, %v993_v16, 0.0 }
 0x5dc   :  { %v996_v18 = vadd.f32 %v995_v17, %v1466_v36 }
 0x5e2   :  { %v1001_v19 = vpop.permute.xlu1 %1000 }
 0x5e3   :  { %v1003_v20 = vsel %vm997_vm14, %v1001_v19, 0.0 }
 0x5e4   :  { %v1004_v21 = vadd.f32 %v1003_v20, %v996_v18 }
 0x5e6   :  { %1005 = vst [vmem:[%s1524_s3] sm:$0xff] %v1004_v21 }
 0x5e7   :  { %1010 = vsyncpa [#allocation4], 1 }
 0x5e8   :  { %1011 = vsyncpa [#allocation6], 1 }

</bundles_post_ra>
